<compile_context>
chip_gen: v6e
topology: v6e:2x2x1
jax: 0.10.0
libtpu: 0.0.40
codegen_flags: <defaults>
</compile_context>

<pallas_src>
import functools

import jax
import jax.numpy as jnp
from jax.experimental import pallas as pl
from jax.experimental.pallas import tpu as pltpu


_ROW_QUANTUM = 32           # row multiple legal for f32/bf16/int8 sublane tiling
_OUT_SUB, _OUT_LANE = 8, 128  # one full f32 vreg of output per grid step


def _round_up(x, m):
    return (x + m - 1) // m * m


def _contrastive_kernel(x0_ref, x1_ref, y_ref, out_ref, *, margin, batch, block_rows):
    i = pl.program_id(0)

    x0 = x0_ref[...].astype(jnp.float32)                    # (TB, D)
    x1 = x1_ref[...].astype(jnp.float32)                    # (TB, D)
    y = y_ref[...].astype(jnp.float32)                       # (TB, 1)

    diff = x0 - x1                                            # VPU
    # Lane reduce per row.  (On v7x at small D this could move to the idle MXU
    # via dot(diff*diff, ones) to unload the XLU; kept on jnp.sum for safety.)
    dist_sq = jnp.sum(diff * diff, axis=1, keepdims=True)     # (TB, 1)
    dist = jnp.sqrt(dist_sq)                                  # EUP
    clamped = jnp.maximum(margin - dist, 0.0)
    loss = y * dist_sq + (1.0 - y) * (clamped * clamped)      # (TB, 1)

    # Mask rows past the true batch: the last (ragged) block reads unspecified
    # padding data which must not leak into the partial sum.
    row = i * block_rows + jax.lax.broadcasted_iota(jnp.int32, (block_rows, 1), 0)
    loss = jnp.where(row < batch, loss, 0.0)

    # One partial sum per grid step, splatted across a full (8,128) block so
    # the store is a single unmasked vst; the wrapper reads element [0, 0].
    partial = jnp.sum(loss, keepdims=True)                    # (1, 1)
    out_ref[...] = jnp.broadcast_to(partial, (_OUT_SUB, _OUT_LANE))


def contrastive_loss(x0, x1, y, margin=1.0):
    """x0, x1: (B, D) float arrays (any float dtype); y: (B,) labels. Scalar f32."""
    B, D = x0.shape
    y2 = y.astype(jnp.float32).reshape(B, 1)

    # Only tiny batches (< one 32-row quantum) get padded; large batches are
    # never copied.  Padded rows are masked out inside the kernel.
    Bp = B
    if B < _ROW_QUANTUM:
        pad = _ROW_QUANTUM - B
        x0 = jnp.pad(x0, ((0, pad), (0, 0)))
        x1 = jnp.pad(x1, ((0, pad), (0, 0)))
        y2 = jnp.pad(y2, ((0, pad), (0, 0)))
        Bp = _ROW_QUANTUM

    # Batch tile: ~4 MiB of lane-padded f32 per input tile (VMEM stores the
    # last dim rounded up to 128 lanes), a multiple of 32 rows, never larger
    # than the batch, and at least two blocks for batches >= 64 rows so the
    # "parallel" grid axis can split across v7x's two TensorCores.
    Dp = _round_up(D, 128)                                   # lane-padded width in VMEM
    budget_rows = (4 * 1024 * 1024 // 4) // Dp               # rows per ~4 MiB f32 tile
    budget_rows = max(_ROW_QUANTUM, budget_rows // _ROW_QUANTUM * _ROW_QUANTUM)
    max_rows = max(_ROW_QUANTUM, Bp // _ROW_QUANTUM * _ROW_QUANTUM)
    tb = min(budget_rows, max_rows)
    if Bp >= 2 * _ROW_QUANTUM:
        tb = min(tb, _round_up(pl.cdiv(Bp, 2), _ROW_QUANTUM))
    num_blocks = pl.cdiv(Bp, tb)

    out = pl.pallas_call(
        functools.partial(_contrastive_kernel, margin=float(margin),
                          batch=B, block_rows=tb),
        out_shape=jax.ShapeDtypeStruct((num_blocks * _OUT_SUB, _OUT_LANE), jnp.float32),
        grid_spec=pltpu.PrefetchScalarGridSpec(
            num_scalar_prefetch=0,
            grid=(num_blocks,),
            in_specs=[
                pl.BlockSpec((tb, D), lambda i: (i, 0)),     # full feature dim per block
                pl.BlockSpec((tb, D), lambda i: (i, 0)),
                pl.BlockSpec((tb, 1), lambda i: (i, 0)),
            ],
            out_specs=pl.BlockSpec((_OUT_SUB, _OUT_LANE), lambda i: (i, 0)),
        ),
        compiler_params=pltpu.CompilerParams(
            # Each grid step writes only its own output block -> independent.
            dimension_semantics=("parallel",),
            # Double-buffered ~4 MiB input tiles + f32 intermediates fit with
            # headroom; 48 MiB is safe on v5e/v6e (128 MiB) and v7x (64 MiB).
            vmem_limit_bytes=48 * 1024 * 1024,
        ),
    )(x0, x1, y2)

    # One scalar per block lives at [block, 0, 0]; tiny epilogue in XLA.
    partials = out.reshape(num_blocks, _OUT_SUB, _OUT_LANE)[:, 0, 0]
    return jnp.sum(partials) / 2.0 / B


def _reference(x0, x1, y, margin=1.0):
    diff = x0 - x1
    dist_sq = jnp.sum(diff ** 2, axis=1)
    dist = jnp.sqrt(dist_sq)
    mdist = jnp.maximum(margin - dist, 0.0)
    loss = y * dist_sq + (1 - y) * mdist ** 2
    return jnp.sum(loss) / 2.0 / x0.shape[0]


if __name__ == "__main__":
    key = jax.random.PRNGKey(0)
    k0, k1, k2 = jax.random.split(key, 3)

    B, D = 8, 32
    x0 = jax.random.normal(k0, (B, D), dtype=jnp.float32)
    x1 = jax.random.normal(k1, (B, D), dtype=jnp.float32)
    y = jax.random.bernoulli(k2, 0.5, (B,)).astype(jnp.float32)

    loss = contrastive_loss(x0, x1, y, margin=1.0)
    jax.block_until_ready(loss)

    ref = _reference(x0, x1, y, margin=1.0)
    assert jnp.allclose(loss, ref, rtol=1e-5, atol=1e-5), (loss, ref)

    print("KERNEL_OK")
</pallas_src>

<mosaic_0001>
module attributes {stable_mosaic.version = 11 : i64} {
  func.func @_contrastive_kernel(%arg0: i32, %arg1: memref<32x32xf32, #tpu.memory_space<vmem>>, %arg2: memref<32x32xf32, #tpu.memory_space<vmem>>, %arg3: memref<32x1xf32, #tpu.memory_space<vmem>>, %arg4: memref<8x128xf32, #tpu.memory_space<vmem>>) attributes {dimension_semantics = [#tpu.dimension_semantics<parallel>], iteration_bounds = array<i64: 1>, scalar_prefetch = 0 : i64, scratch_operands = 0 : i64, tpu.core_type = #tpu.core_type<tc>, window_params = [{transform_indices = @transform_0, window_bounds = array<i64: 32, 32>}, {transform_indices = @transform_1, window_bounds = array<i64: 32, 32>}, {transform_indices = @transform_2, window_bounds = array<i64: 32, 1>}, {transform_indices = @transform_3, window_bounds = array<i64: 8, 128>}]} {
    %c0 = arith.constant 0 : index
    %c0_0 = arith.constant 0 : index
    %0 = vector.load %arg1[%c0, %c0_0] : memref<32x32xf32, #tpu.memory_space<vmem>>, vector<32x32xf32>
    %c0_1 = arith.constant 0 : index
    %c0_2 = arith.constant 0 : index
    %1 = vector.load %arg2[%c0_1, %c0_2] : memref<32x32xf32, #tpu.memory_space<vmem>>, vector<32x32xf32>
    %c0_3 = arith.constant 0 : index
    %c0_4 = arith.constant 0 : index
    %2 = vector.load %arg3[%c0_3, %c0_4] : memref<32x1xf32, #tpu.memory_space<vmem>>, vector<32x1xf32>
    %3 = arith.subf %0, %1 : vector<32x32xf32>
    %4 = arith.mulf %3, %3 : vector<32x32xf32>
    %cst = arith.constant dense<0.000000e+00> : vector<32xf32>
    %5 = vector.multi_reduction <add>, %4, %cst [1] : vector<32x32xf32> to vector<32xf32>
    %6 = vector.shape_cast %5 : vector<32xf32> to vector<32x1xf32>
    %7 = math.sqrt %6 : vector<32x1xf32>
    %cst_5 = arith.constant 1.000000e+00 : f32
    %8 = vector.broadcast %cst_5 : f32 to vector<32x1xf32>
    %9 = arith.subf %8, %7 : vector<32x1xf32>
    %cst_6 = arith.constant 0.000000e+00 : f32
    %10 = vector.broadcast %cst_6 : f32 to vector<32x1xf32>
    %11 = arith.maximumf %9, %10 : vector<32x1xf32>
    %12 = arith.mulf %2, %6 : vector<32x1xf32>
    %cst_7 = arith.constant 1.000000e+00 : f32
    %13 = vector.broadcast %cst_7 : f32 to vector<32x1xf32>
    %14 = arith.subf %13, %2 : vector<32x1xf32>
    %15 = arith.mulf %11, %11 : vector<32x1xf32>
    %16 = arith.mulf %14, %15 : vector<32x1xf32>
    %17 = arith.addf %12, %16 : vector<32x1xf32>
    %c32_i32 = arith.constant 32 : i32
    %18 = arith.muli %arg0, %c32_i32 : i32
    %19 = tpu.iota {dimensions = array<i32: 0>} : vector<32x1xi32>
    %20 = vector.broadcast %18 : i32 to vector<32x1xi32>
    %21 = arith.addi %20, %19 : vector<32x1xi32>
    %c8_i32 = arith.constant 8 : i32
    %22 = vector.broadcast %c8_i32 : i32 to vector<32x1xi32>
    %23 = arith.cmpi slt, %21, %22 : vector<32x1xi32>
    %cst_8 = arith.constant 0.000000e+00 : f32
    %24 = vector.broadcast %cst_8 : f32 to vector<32x1xf32>
    %25 = arith.select %23, %17, %24 : vector<32x1xi1>, vector<32x1xf32>
    %26 = vector.shape_cast %25 : vector<32x1xf32> to vector<1x32x1xf32>
    %cst_9 = arith.constant dense<0.000000e+00> : vector<1xf32>
    %27 = vector.multi_reduction <add>, %26, %cst_9 [1, 2] : vector<1x32x1xf32> to vector<1xf32>
    %28 = vector.shape_cast %27 : vector<1xf32> to vector<1x1x1xf32>
    %29 = vector.extract %28[0, 0, 0] : f32 from vector<1x1x1xf32>
    %30 = vector.broadcast %29 : f32 to vector<1x1xf32>
    %31 = vector.shape_cast %30 : vector<1x1xf32> to vector<1x1xf32>
    %32 = vector.broadcast %31 : vector<1x1xf32> to vector<8x128xf32>
    %c0_10 = arith.constant 0 : index
    %c0_11 = arith.constant 0 : index
    %33 = vector.load %arg4[%c0_10, %c0_11] : memref<8x128xf32, #tpu.memory_space<vmem>>, vector<8x128xf32>
    tpu.vector_store %arg4[%c0_10, %c0_11], %32 {strides = array<i32>} : memref<8x128xf32, #tpu.memory_space<vmem>>, vector<8x128xf32>,
    return
  }
  func.func @transform_0(%arg0: i32) -> (i32, i32) {
    %c0_i32 = arith.constant 0 : i32
    %c0_i32_0 = arith.constant 0 : i32
    return %arg0, %c0_i32 : i32, i32
  }
  func.func @transform_1(%arg0: i32) -> (i32, i32) {
    %c0_i32 = arith.constant 0 : i32
    %c0_i32_0 = arith.constant 0 : i32
    return %arg0, %c0_i32 : i32, i32
  }
  func.func @transform_2(%arg0: i32) -> (i32, i32) {
    %c0_i32 = arith.constant 0 : i32
    %c0_i32_0 = arith.constant 0 : i32
    return %arg0, %c0_i32 : i32, i32
  }
  func.func @transform_3(%arg0: i32) -> (i32, i32) {
    %c0_i32 = arith.constant 0 : i32
    %c0_i32_0 = arith.constant 0 : i32
    return %arg0, %c0_i32 : i32, i32
  }
}

</mosaic_0001>

<bundles_post_ra>
// kernel: tpu_custom_call.1
= control target key start
LH: loop header
LB: loop body
LE: loop exit
PB: predicated region body
PF: predicated region fallthrough
CT: control target
= control target key end

     0   :  { %8 = vsyncpa [#allocation3], 0  ;;  %s259_s0 = inlined_call_operand.vmem [shape: f32[32,32], index: 0, kind: input, shape index: {}]   ;;  %s260_s1 = inlined_call_operand.hbm [shape: f32[32,32], index: 1, kind: input, shape index: {}]   ;;  %s261_s2 = inlined_call_operand.vmem [shape: f32[32,1], index: 2, kind: input, shape index: {}]   ;;  %s262_s3 = inlined_call_operand.hbm [shape: f32[8,128], index: 3, kind: output, shape index: {}]  }
   0x1   :  { %9 = vsyncpa [#allocation4], 0  ;;  %s223_s12 = smov [#allocation2]  }
   0x2   :  { %s17_s13 = sshll.u32 %s223_s12, 4  ;;  %s18_s13 = int_to_ptr.vmem [resolvable:$true] %s17_s13 }
   0x3   :  { %s187_s14 = scalar_lea.vmem %s18_s13, 512  ;;  %p192_p1 = scmp.lt.s32.totalorder %s18_s13, %s18_s13 }
   0x4   :  { %p188_p0 = scmp.ne.s32.totalorder %s18_s13, %s187_s14  ;;  %p193_p2 = scmp.lt.s32.totalorder %s187_s14, %s187_s14 }
   0x6   :  { %p194_p3 = por %p193_p2, %p192_p1 }
   0x8   :  { %p195_p4 = pnand %p194_p3, %p188_p0 }
   0xa   :  { %198 = shalt.err (!%p195_p4)
}
   0xb   :  { %s224_s15 = smov 128   ;;  %s225_s16 = smov 8  }
   0xc   :  { %23 = dma.hbm_to_vmem [thread:$0]  %s260_s1, 512, %s18_s13, [#allocation3], %s224_s15, %s224_s15, %s225_s16  }
   0xd   :  { %219 = dma.done.wait [#allocation3], 512  }
   0xe   :  { %220 = vsyncadd [#allocation3], 4294966784  ;;  %v29_v0 = vld [vmem:[%s259_s0] sm:$0xff]  ;;  %vm49_vm0 = vcmask 261120   ;;  %vm137_vm3 = vcmask 7168   ;;  %s226_s0 = smov [#allocation5]  }
   0xf   :  { %v33_v1 = vld [vmem:[#allocation2] sm:$0xff]  ;;  %s162_s22 = sshll.u32 %s226_s0, 4  ;;  %s163_s22 = int_to_ptr.vmem [resolvable:$true] %s162_s22 }
  0x10   :  { %v41_v2 = vsub.f32 %v29_v0, %v33_v1  ;;  %v37_v12 = vld [vmem:[%s261_s2] sm:$0xff]  ;;  %s199_s23 = scalar_lea.vmem %s163_s22, 128  ;;  %p204_p6 = scmp.lt.s32.totalorder %s163_s22, %s163_s22 }
  0x11   :  { %v102_v14 = vsub.f32 1.0, %v37_v12  ;;  %p200_p5 = scmp.ne.s32.totalorder %s163_s22, %s199_s23  ;;  %p205_p7 = scmp.lt.s32.totalorder %s199_s23, %s199_s23 }
  0x12   :  { %v45_v3 = vmul.f32 %v41_v2, %v41_v2 }
  0x13   :  { %p206_p8 = por %p205_p7, %p204_p6 }
  0x14   :  { %v50_v4 = vsel %vm49_vm0, %v45_v3, 0.0 }
  0x15   :  { %51 = vadd.xlane.f32.xlu0 %v50_v4  ;;  %p207_p9 = pnand %p206_p8, %p200_p5 }
  0x9e   :  { %v52_v5 = vpop.xlane.xlu0 %51 }
  0x9f   :  { %177 = vrsqrt.f32 %v52_v5  ;;  %vm64_vm1 = vcmp.eq.f32.partialorder %v52_v5, inf  ;;  %v67_v8 = vand.u32 2147483648, %v52_v5  ;;  %vm66_vm2 = vcmp.eq.f32.partialorder %v52_v5, 0.0 }
  0xa0   :  { %v98_v16 = vmul.f32 %v52_v5, %v37_v12 }
  0xac   :  { %v178_v6 = vpop.eup %177 }
  0xad   :  { %v63_v7 = vmul.f32 %v178_v6, %v52_v5 }
  0xaf   :  { %v65_v9 = vsel %vm64_vm1, %v52_v5, %v63_v7 }
  0xb0   :  { %v68_v10 = vsel %vm66_vm2, %v67_v8, %v65_v9 }
  0xb1   :  { %v90_v11 = vsub.f32 1.0, %v68_v10 }
  0xb3   :  { %v94_v13 = vmax.f32 %v90_v11, 0.0 }
  0xb5   :  { %v106_v15 = vmul.f32 %v94_v13, %v94_v13 }
  0xb7   :  { %v110_v17 = vmul.f32 %v106_v15, %v102_v14 }
  0xb9   :  { %v114_v18 = vadd.f32 %v110_v17, %v98_v16 }
  0xbb   :  { %v138_v19 = vsel %vm137_vm3, %v114_v18, 0.0 }
  0xbc   :  { %145 = vadd.xlane.f32.xlu0 %v138_v19 }
 0x145   :  { %v146_v20 = vpop.xlane.xlu0 %145 }
 0x146   :  { %v147_v21 = vrot.slane %v146_v20, 4 }
 0x148   :  { %v148_v22 = vadd.f32 %v147_v21, %v146_v20 }
 0x14a   :  { %v149_v23 = vrot.slane %v148_v22, 2 }
 0x14c   :  { %v150_v24 = vadd.f32 %v149_v23, %v148_v22 }
 0x14e   :  { %v151_v25 = vrot.slane %v150_v24, 1 }
 0x150   :  { %v152_v26 = vadd.f32 %v151_v25, %v150_v24 }
 0x152   :  { %171 = vpush %v152_v26 }
 0x183   :  { %s172_s2 = spop %171 }
 0x184   :  { %v154_v27 = vstv %s172_s2 }
 0x185   :  { %155 = vst [vmem:[#allocation5] sm:$0xff] %v154_v27 }
 0x186   :  { %210 = shalt.err (!%p207_p9)
}
 0x187   :  { %165 = dma.vmem_to_hbm [thread:$0]  %s163_s22, 128, %s262_s3, [#allocation4]  }
 0x188   :  { %221 = dma.done.wait [#allocation4], 128  }
 0x189   :  { %222 = vsyncadd [#allocation4], 4294967168 }
 0x18a   :  { %169 = vsyncpa [#allocation3], 1 }
 0x18b   :  { %170 = vsyncpa [#allocation4], 1 }

</bundles_post_ra>
